<compile_context>
chip_gen: v7x
topology: tpu7x:2x2x1
jax: 0.10.0
libtpu: 0.0.40
codegen_flags: <defaults>
</compile_context>

<pallas_src>
import math
import functools

import jax
import jax.numpy as jnp
from jax.experimental import pallas as pl
from jax.experimental.pallas import tpu as pltpu


def edge_mlp_kernel(x_ref, w0t_ref, b0_ref, w1t_ref, b1_ref, w2t_ref, b2_ref,
                    out_ref):
    """Lane-dense MLP: tiles are [features, tile_e] (edges on the lane axis)."""
    # Layer 0: (hid, n_in) @ (n_in, tile_e) -> (hid, tile_e), f32 accumulate.
    h = jnp.dot(w0t_ref[...], x_ref[...],
                preferred_element_type=jnp.float32) + b0_ref[...]
    h = jnp.maximum(h, 0.0)                                    # Act0 (ReLU)

    # Layer 1: (hid, hid) @ (hid, tile_e)
    h = jnp.dot(w1t_ref[...], h.astype(w1t_ref.dtype),
                preferred_element_type=jnp.float32) + b1_ref[...]
    h = jnp.maximum(h, 0.0)                                    # Act1 (ReLU)

    # Layer 2 (output): (f_out_pad, hid) @ (hid, tile_e)
    out_ref[...] = (jnp.dot(w2t_ref[...], h.astype(w2t_ref.dtype),
                            preferred_element_type=jnp.float32)
                    + b2_ref[...]).astype(out_ref.dtype)


@functools.partial(jax.jit,
                   static_argnames=("tile_e", "compute_dtype", "x_buffers"))
def edge_model_forward(src, dest, edge_attr, params, *, tile_e=2048,
                       compute_dtype=jnp.bfloat16, x_buffers=2):
    """EdgeModel forward. src/dest: (E, f_n), edge_attr: (E, f_e) -> (E, f_out)."""
    E = src.shape[0]
    n_in = 2 * src.shape[1] + edge_attr.shape[1]
    hid = params["w0"].shape[1]
    f_out = params["w2"].shape[1]
    out_dtype = src.dtype
    itemsize = jnp.dtype(compute_dtype).itemsize

    # ---- tile sizing --------------------------------------------------------
    tile_e = max(128, (tile_e // 128) * 128)                # lane axis: mult of 128
    tile_e = min(tile_e, max(128, 128 * pl.cdiv(E, 128)))   # don't over-pad tiny E
    tile_e = min(tile_e, 65536)                             # v7x 64 MiB VMEM safety
    # v7x has 2 TensorCores: keep >= 2 grid steps on the "parallel" edge axis
    # so work can shard across cores (zero effect on single-TC v5e/v6e).
    if pl.cdiv(E, tile_e) < 2 and E > 1024:
        tile_e = max(512, 128 * pl.cdiv(pl.cdiv(E, 2), 128))
    grid_e = pl.cdiv(E, tile_e)
    e_pad = grid_e * tile_e

    # Output features padded to a full 8-row sublane tile -> unmasked vst and
    # full-tile output DMAs (f_out=4 would otherwise half-fill the tile).
    f_out_pad = 8 * pl.cdiv(f_out, 8)

    # ---- wrapper-side layout plumbing (concat + transpose to lane-dense) ----
    x_t = jnp.concatenate([src, dest, edge_attr], axis=1).T.astype(compute_dtype)
    if e_pad != E:
        x_t = jnp.pad(x_t, ((0, 0), (0, e_pad - E)))        # (n_in, e_pad)

    # Pre-transposed weights (out_dim, in_dim) in the compute dtype; biases stay
    # f32 (added to the f32 accumulator) as lane-broadcast columns.
    w0t = params["w0"].T.astype(compute_dtype)               # (hid, n_in)
    w1t = params["w1"].T.astype(compute_dtype)               # (hid, hid)
    w2t = params["w2"].T.astype(compute_dtype)               # (f_out, hid)
    b0 = params["b0"].reshape(hid, 1).astype(jnp.float32)
    b1 = params["b1"].reshape(hid, 1).astype(jnp.float32)
    b2 = params["b2"].reshape(f_out, 1).astype(jnp.float32)
    if f_out_pad != f_out:
        w2t = jnp.pad(w2t, ((0, f_out_pad - f_out), (0, 0)))
        b2 = jnp.pad(b2, ((0, f_out_pad - f_out), (0, 0)))

    # ---- specs --------------------------------------------------------------
    # Deeper input pipeline (e.g. x_buffers=3) only if exposed DMA shows up on
    # v5e's lower HBM bandwidth; default stays at the standard double buffer.
    x_spec_kwargs = {}
    if x_buffers != 2:
        x_spec_kwargs["pipeline_mode"] = pl.Buffered(x_buffers)
    x_spec = pl.BlockSpec((n_in, tile_e), lambda i: (0, i), **x_spec_kwargs)
    out_spec = pl.BlockSpec((f_out_pad, tile_e), lambda i: (0, i))
    full = lambda shape: pl.BlockSpec(shape, lambda i: (0, 0))  # resident weights

    grid_spec = pltpu.PrefetchScalarGridSpec(
        num_scalar_prefetch=0,
        grid=(grid_e,),
        in_specs=[
            x_spec,                          # packed [src|dest|edge_attr]^T tile
            full(w0t.shape), full(b0.shape),
            full(w1t.shape), full(b1.shape),
            full(w2t.shape), full(b2.shape),
        ],
        out_specs=out_spec,
    )

    flops = 2 * e_pad * (n_in * hid + hid * hid + hid * f_out_pad)
    bytes_accessed = (e_pad * n_in * itemsize                              # input
                      + e_pad * f_out_pad * jnp.dtype(out_dtype).itemsize  # output
                      + (w0t.size + w1t.size + w2t.size) * itemsize
                      + (b0.size + b1.size + b2.size) * 4)
    cost = pl.CostEstimate(flops=int(flops), transcendentals=0,
                           bytes_accessed=int(bytes_accessed))

    out_t = pl.pallas_call(
        edge_mlp_kernel,
        out_shape=jax.ShapeDtypeStruct((f_out_pad, e_pad), out_dtype),
        grid_spec=grid_spec,
        compiler_params=pltpu.CompilerParams(
            dimension_semantics=("parallel",),
            # Let XLA fuse the concat/transpose/pad/cast producer into the x
            # operand instead of a separate HBM round trip.
            allow_input_fusion=[True, False, False, False, False, False, False],
        ),
        cost_estimate=cost,
    )(x_t, w0t, b0, w1t, b1, w2t, b2)

    # Back to the PyTorch (E, f_out) convention; drop feature/edge pad.
    return out_t[:f_out, :E].T


def init_edge_model_params(key, num_edge_feats, num_node_feats, size_hid_layers):
    """Deterministic Xavier-normal weights, bias=0.01 (matches init_weights)."""
    num_inputs = num_edge_feats + 2 * num_node_feats

    def xavier_normal_t(k, fan_in, fan_out):
        # torch Linear weight is (out, in); we store the transpose (in, out).
        std = math.sqrt(2.0 / (fan_in + fan_out))
        return std * jax.random.normal(k, (fan_in, fan_out), dtype=jnp.float32)

    k0, k1, k2 = jax.random.split(key, 3)
    return {
        "w0": xavier_normal_t(k0, num_inputs, size_hid_layers),       # Lin0
        "b0": jnp.full((size_hid_layers,), 0.01, jnp.float32),
        "w1": xavier_normal_t(k1, size_hid_layers, size_hid_layers),  # Lin1
        "b1": jnp.full((size_hid_layers,), 0.01, jnp.float32),
        "w2": xavier_normal_t(k2, size_hid_layers, num_edge_feats),   # Lin2
        "b2": jnp.full((num_edge_feats,), 0.01, jnp.float32),
    }


def edge_model_ref(src, dest, edge_attr, params):
    x = jnp.concatenate([src, dest, edge_attr], axis=1)
    h = jnp.maximum(x @ params["w0"] + params["b0"], 0.0)
    h = jnp.maximum(h @ params["w1"] + params["b1"], 0.0)
    return h @ params["w2"] + params["b2"]


if __name__ == "__main__":
    # Config: num_edge_feats=4, num_node_feats=6, num_hid_layers=2,
    # size_hid_layers=32, activation=ReLU, norm=None.
    NUM_EDGE_FEATS = 4
    NUM_NODE_FEATS = 6
    SIZE_HID = 32
    NUM_EDGES = 2000          # not a multiple of the tile (ragged tail exercised)

    key = jax.random.PRNGKey(0)
    k_src, k_dst, k_ea, k_par = jax.random.split(key, 4)

    src = jax.random.normal(k_src, (NUM_EDGES, NUM_NODE_FEATS), jnp.float32)
    dest = jax.random.normal(k_dst, (NUM_EDGES, NUM_NODE_FEATS), jnp.float32)
    edge_attr = jax.random.normal(k_ea, (NUM_EDGES, NUM_EDGE_FEATS), jnp.float32)
    params = init_edge_model_params(k_par, NUM_EDGE_FEATS, NUM_NODE_FEATS, SIZE_HID)

    ref = edge_model_ref(src, dest, edge_attr, params)

    # f32 compute path — tight check against the reference.
    out_f32 = edge_model_forward(src, dest, edge_attr, params,
                                 tile_e=2048, compute_dtype=jnp.float32)
    out_f32 = jax.block_until_ready(out_f32)
    assert out_f32.shape == (NUM_EDGES, NUM_EDGE_FEATS)
    assert jnp.allclose(out_f32, ref, atol=1e-5, rtol=1e-5)

    # Default path: bf16 inputs/weights, f32 accumulation — loose check.
    out_def = edge_model_forward(src, dest, edge_attr, params)
    out_def = jax.block_until_ready(out_def)
    assert out_def.shape == (NUM_EDGES, NUM_EDGE_FEATS)
    assert jnp.allclose(out_def.astype(jnp.float32), ref, atol=1e-1, rtol=1e-1)

    print("KERNEL_OK")
</pallas_src>

<mosaic_0001>
module attributes {stable_mosaic.version = 11 : i64} {
  func.func @edge_mlp_kernel(%arg0: i32, %arg1: memref<16x1024xf32, #tpu.memory_space<vmem>>, %arg2: memref<32x16xf32, #tpu.memory_space<vmem>>, %arg3: memref<32x1xf32, #tpu.memory_space<vmem>>, %arg4: memref<32x32xf32, #tpu.memory_space<vmem>>, %arg5: memref<32x1xf32, #tpu.memory_space<vmem>>, %arg6: memref<8x32xf32, #tpu.memory_space<vmem>>, %arg7: memref<8x1xf32, #tpu.memory_space<vmem>>, %arg8: memref<8x1024xf32, #tpu.memory_space<vmem>>) attributes {dimension_semantics = [#tpu.dimension_semantics<parallel>], iteration_bounds = array<i64: 2>, scalar_prefetch = 0 : i64, scratch_operands = 0 : i64, tpu.core_type = #tpu.core_type<tc>, window_params = [{transform_indices = @transform_0, window_bounds = array<i64: 16, 1024>}, {pipeline_mode = #tpu.pipeline_mode<synchronous>, transform_indices = @transform_1, window_bounds = array<i64: 32, 16>}, {pipeline_mode = #tpu.pipeline_mode<synchronous>, transform_indices = @transform_2, window_bounds = array<i64: 32, 1>}, {pipeline_mode = #tpu.pipeline_mode<synchronous>, transform_indices = @transform_3, window_bounds = array<i64: 32, 32>}, {pipeline_mode = #tpu.pipeline_mode<synchronous>, transform_indices = @transform_4, window_bounds = array<i64: 32, 1>}, {pipeline_mode = #tpu.pipeline_mode<synchronous>, transform_indices = @transform_5, window_bounds = array<i64: 8, 32>}, {pipeline_mode = #tpu.pipeline_mode<synchronous>, transform_indices = @transform_6, window_bounds = array<i64: 8, 1>}, {transform_indices = @transform_7, window_bounds = array<i64: 8, 1024>}]} {
    %c0 = arith.constant 0 : index
    %c0_0 = arith.constant 0 : index
    %0 = vector.load %arg2[%c0, %c0_0] : memref<32x16xf32, #tpu.memory_space<vmem>>, vector<32x16xf32>
    %c0_1 = arith.constant 0 : index
    %c0_2 = arith.constant 0 : index
    %1 = vector.load %arg1[%c0_1, %c0_2] : memref<16x1024xf32, #tpu.memory_space<vmem>>, vector<16x1024xf32>
    %cst = arith.constant dense<0.000000e+00> : vector<32x1024xf32>
    %2 = tpu.matmul %0, %1, %cst {dimension_numbers = #tpu.dot_dimension_numbers<[1], [0], [0], [1], [0, 0, 1, 1], [], []>} : vector<32x16xf32>, vector<16x1024xf32>, vector<32x1024xf32> -> vector<32x1024xf32>
    %c0_3 = arith.constant 0 : index
    %c0_4 = arith.constant 0 : index
    %3 = vector.load %arg3[%c0_3, %c0_4] : memref<32x1xf32, #tpu.memory_space<vmem>>, vector<32x1xf32>
    %4 = vector.broadcast %3 : vector<32x1xf32> to vector<32x1024xf32>
    %5 = arith.addf %2, %4 : vector<32x1024xf32>
    %cst_5 = arith.constant 0.000000e+00 : f32
    %6 = vector.broadcast %cst_5 : f32 to vector<32x1024xf32>
    %7 = arith.maximumf %5, %6 : vector<32x1024xf32>
    %c0_6 = arith.constant 0 : index
    %c0_7 = arith.constant 0 : index
    %8 = vector.load %arg4[%c0_6, %c0_7] : memref<32x32xf32, #tpu.memory_space<vmem>>, vector<32x32xf32>
    %cst_8 = arith.constant dense<0.000000e+00> : vector<32x1024xf32>
    %9 = tpu.matmul %8, %7, %cst_8 {dimension_numbers = #tpu.dot_dimension_numbers<[1], [0], [0], [1], [0, 0, 1, 1], [], []>} : vector<32x32xf32>, vector<32x1024xf32>, vector<32x1024xf32> -> vector<32x1024xf32>
    %c0_9 = arith.constant 0 : index
    %c0_10 = arith.constant 0 : index
    %10 = vector.load %arg5[%c0_9, %c0_10] : memref<32x1xf32, #tpu.memory_space<vmem>>, vector<32x1xf32>
    %11 = vector.broadcast %10 : vector<32x1xf32> to vector<32x1024xf32>
    %12 = arith.addf %9, %11 : vector<32x1024xf32>
    %cst_11 = arith.constant 0.000000e+00 : f32
    %13 = vector.broadcast %cst_11 : f32 to vector<32x1024xf32>
    %14 = arith.maximumf %12, %13 : vector<32x1024xf32>
    %c0_12 = arith.constant 0 : index
    %c0_13 = arith.constant 0 : index
    %15 = vector.load %arg6[%c0_12, %c0_13] : memref<8x32xf32, #tpu.memory_space<vmem>>, vector<8x32xf32>
    %cst_14 = arith.constant dense<0.000000e+00> : vector<8x1024xf32>
    %16 = tpu.matmul %15, %14, %cst_14 {dimension_numbers = #tpu.dot_dimension_numbers<[1], [0], [0], [1], [0, 0, 1, 1], [], []>} : vector<8x32xf32>, vector<32x1024xf32>, vector<8x1024xf32> -> vector<8x1024xf32>
    %c0_15 = arith.constant 0 : index
    %c0_16 = arith.constant 0 : index
    %17 = vector.load %arg7[%c0_15, %c0_16] : memref<8x1xf32, #tpu.memory_space<vmem>>, vector<8x1xf32>
    %18 = vector.broadcast %17 : vector<8x1xf32> to vector<8x1024xf32>
    %19 = arith.addf %16, %18 : vector<8x1024xf32>
    %c0_17 = arith.constant 0 : index
    %c0_18 = arith.constant 0 : index
    %20 = vector.load %arg8[%c0_17, %c0_18] : memref<8x1024xf32, #tpu.memory_space<vmem>>, vector<8x1024xf32>
    tpu.vector_store %arg8[%c0_17, %c0_18], %19 {strides = array<i32>} : memref<8x1024xf32, #tpu.memory_space<vmem>>, vector<8x1024xf32>,
    return
  }
  func.func @transform_0(%arg0: i32) -> (i32, i32) {
    %c0_i32 = arith.constant 0 : i32
    %c0_i32_0 = arith.constant 0 : i32
    return %c0_i32, %arg0 : i32, i32
  }
  func.func @transform_1(%arg0: i32) -> (i32, i32) {
    %c0_i32 = arith.constant 0 : i32
    %c0_i32_0 = arith.constant 0 : i32
    %c0_i32_1 = arith.constant 0 : i32
    return %c0_i32, %c0_i32_0 : i32, i32
  }
  func.func @transform_2(%arg0: i32) -> (i32, i32) {
    %c0_i32 = arith.constant 0 : i32
    %c0_i32_0 = arith.constant 0 : i32
    %c0_i32_1 = arith.constant 0 : i32
    return %c0_i32, %c0_i32_0 : i32, i32
  }
  func.func @transform_3(%arg0: i32) -> (i32, i32) {
    %c0_i32 = arith.constant 0 : i32
    %c0_i32_0 = arith.constant 0 : i32
    %c0_i32_1 = arith.constant 0 : i32
    return %c0_i32, %c0_i32_0 : i32, i32
  }
  func.func @transform_4(%arg0: i32) -> (i32, i32) {
    %c0_i32 = arith.constant 0 : i32
    %c0_i32_0 = arith.constant 0 : i32
    %c0_i32_1 = arith.constant 0 : i32
    return %c0_i32, %c0_i32_0 : i32, i32
  }
  func.func @transform_5(%arg0: i32) -> (i32, i32) {
    %c0_i32 = arith.constant 0 : i32
    %c0_i32_0 = arith.constant 0 : i32
    %c0_i32_1 = arith.constant 0 : i32
    return %c0_i32, %c0_i32_0 : i32, i32
  }
  func.func @transform_6(%arg0: i32) -> (i32, i32) {
    %c0_i32 = arith.constant 0 : i32
    %c0_i32_0 = arith.constant 0 : i32
    %c0_i32_1 = arith.constant 0 : i32
    return %c0_i32, %c0_i32_0 : i32, i32
  }
  func.func @transform_7(%arg0: i32) -> (i32, i32) {
    %c0_i32 = arith.constant 0 : i32
    %c0_i32_0 = arith.constant 0 : i32
    return %c0_i32, %arg0 : i32, i32
  }
}

</mosaic_0001>

<bundles_post_ra>
// kernel: edge_model_forward.2
= control target key start
LH: loop header
LB: loop body
LE: loop exit
PB: predicated region body
PF: predicated region fallthrough
CT: control target
= control target key end

     0   :  { %s2033_s29 = smov 0   ;;  %s2351_s0 = inlined_call_operand.vmem [shape: f32[32,16], index: 0, kind: input, shape index: {}]   ;;  %s2352_s1 = inlined_call_operand.vmem [shape: f32[32,1], index: 1, kind: input, shape index: {}]   ;;  %s2353_s2 = inlined_call_operand.vmem [shape: f32[32,32], index: 2, kind: input, shape index: {}]   ;;  %s2354_s3 = inlined_call_operand.vmem [shape: f32[32,1], index: 3, kind: input, shape index: {}]   ;;  %s2355_s4 = inlined_call_operand.vmem [shape: f32[8,32], index: 4, kind: input, shape index: {}]   ;;  %s2356_s5 = inlined_call_operand.vmem [shape: f32[8,1], index: 5, kind: input, shape index: {}]   ;;  %s2357_s6 = inlined_call_operand.vmem [shape: f32[16,2000], index: 6, kind: input, shape index: {}]   ;;  %s2358_s7 = inlined_call_operand.<no memory space> [shape: f32[], index: 7, kind: input, shape index: {}]   ;;  %s2359_s8 = inlined_call_operand.vmem [shape: f32[8,2048], index: 8, kind: output, shape index: {}]  }
   0x1   :  { %v2031_v0 = vstv %s2358_s7 }
   0x2 LB: > { %s1758_s30 = sadd.s32 4294967295, %s1979_s29   ;;  %p1762_p0 = scmp.ge.s32.totalorder %s1979_s29, 1  ;;  %s1979_s29 = sphi %s2033_s29, %s19_s29  }
   0x3   : > { %p248_p1 = scmp.lt.s32.totalorder %s1979_s29, 3 }
   0x5   : > { %p249_p2 = pnand %p1762_p0, %p248_p1 }
   0x6   : > { %s2041_s9 = sshll.u32 (!%p249_p2), %s1758_s30, 3  ;;  %s2043_s7 = sshll.u32 (!%p249_p2), %s1758_s30, 10  ;;  %v306_v1 = vlaneseq (!%p249_p2)  ;;  %v1981_v3 = vmov (!%p249_p2), 0.0   ;;  %v546_v4 = vld [vmem:[%s2352_s1] sm:$0xff] (!%p249_p2)  ;;  %v1982_v7 = vmov (!%p249_p2), 0   ;;  %v548_v8 = vld [vmem:[%s2352_s1 + $0x10] sm:$0xff] (!%p249_p2) }
   0x7   : > { %252 = sbr.rel (%p249_p2) target bundleno = 730 (0x2da), region = 48  ;;  %p289_p3 = scmp.lt.s32.totalorder (!%p249_p2), %s2041_s9, 15  ;;  %v308_v2 = vstv (!%p249_p2), %s2043_s7  ;;  %647 = vmatprep.mubr.f32.mxu0 (!%p249_p2), %v1981_v3  ;;  %736 = vmatprep.mubr.f32.mxu1 (!%p249_p2), %v1981_v3  ;;  %v547_v15 = vld [vmem:[%s2352_s1 + $0x8] sm:$0xff] (!%p249_p2)  ;;  %v549_v16 = vld [vmem:[%s2352_s1 + $0x18] sm:$0xff] (!%p249_p2)  ;;  %v975_v18 = vld [vmem:[%s2354_s3] sm:$0xff] (!%p249_p2)  ;;  %vm570_vm4 = vcmask (!%p249_p2), 130048  }
   0x8   : > { %s1839_s10 = sadd.s32 (!%p249_p2), 128, %s2043_s7  ;;  %v2053_v5 = vand.u32 (!%p249_p2), 127, %v306_v1  ;;  %s1843_s13 = sadd.s32 (!%p249_p2), 384, %s2043_s7  ;;  %1971 = vset.pattern.permute.xlu0 (!%p249_p2), %v1982_v7  ;;  %1972 = vset.pattern.permute.xlu1 (!%p249_p2), %v1982_v7  ;;  %v976_v44 = vld [vmem:[%s2354_s3 + $0x8] sm:$0xff] (!%p249_p2)  ;;  %v526_v49 = vld [vmem:[%s2351_s0] sm:$0xff] (!%p249_p2)  ;;  %v977_v63 = vld [vmem:[%s2354_s3 + $0x10] sm:$0xff] (!%p249_p2) }
   0x9   : > { %v320_v6 = vstv (!%p249_p2), %s1839_s10  ;;  %s1841_s14 = sadd.s32 (!%p249_p2), 256, %s2043_s7  ;;  %v346_v9 = vstv (!%p249_p2), %s1843_s13  ;;  %552 = vperm.xlu0 (!%p249_p2), %1971, %v546_v4   ;;  %562 = vperm.xlu1 (!%p249_p2), %1972, %v548_v8   ;;  %s1847_s18 = sadd.s32 (!%p249_p2), 640, %s2043_s7  ;;  %v978_v4 = vld [vmem:[%s2354_s3 + $0x18] sm:$0xff] (!%p249_p2)  ;;  %vm999_vm10 = vcmask (!%p249_p2), 261120  }
   0xa   : > { %v333_v10 = vstv (!%p249_p2), %s1841_s14  ;;  %v321_v11 = vadd.s32 (!%p249_p2), %v320_v6, %v2053_v5  ;;  %v347_v12 = vadd.s32 (!%p249_p2), %v346_v9, %v2053_v5  ;;  %v309_v13 = vadd.s32 (!%p249_p2), %v308_v2, %v2053_v5  ;;  %s393_s19 = sadd.s32 (!%p249_p2), 7, %s2041_s9  ;;  %s1851_s10 = sadd.s32 (!%p249_p2), 896, %s2043_s7 }
   0xb   : > { %v334_v14 = vadd.s32 (!%p249_p2), %v333_v10, %v2053_v5  ;;  %v372_v17 = vstv (!%p249_p2), %s1847_s18  ;;  %s394_s25 = ssub.s32 (!%p249_p2), 15, %s393_s19  ;;  %s1845_s12 = sadd.s32 (!%p249_p2), 512, %s2043_s7  ;;  %v407_v47 = vstv (!%p249_p2), %s1851_s10 }
   0xc   : > { %vm322_vm0 = vcmp.lt.s32.totalorder (!%p249_p2), %v321_v11, 2000  ;;  %vm348_vm1 = vcmp.lt.s32.totalorder (!%p249_p2), %v347_v12, 2000  ;;  %vm310_vm2 = vcmp.lt.s32.totalorder (!%p249_p2), %v309_v13, 2000  ;;  %p395_p4 = scmp.lt.s32.totalorder (!%p249_p2), %s394_s25, 0  ;;  %v373_v22 = vadd.s32 (!%p249_p2), %v372_v17, %v2053_v5  ;;  %s1849_s13 = sadd.s32 (!%p249_p2), 768, %s2043_s7  ;;  %v1401_v13 = vld [vmem:[%s2356_s5] sm:$0xff] (!%p249_p2) }
   0xd   : > { %vm335_vm3 = vcmp.lt.s32.totalorder (!%p249_p2), %v334_v14, 2000  ;;  %v400_v23 = vstv (!%p249_p2), %s394_s25  ;;  %557 = vperm.xlu0 (!%p249_p2), %1971, %v547_v15   ;;  %567 = vperm.xlu1 (!%p249_p2), %1972, %v549_v16   ;;  %v408_v52 = vadd.s32 (!%p249_p2), %v407_v47, %v2053_v5  ;;  %v359_v53 = vstv (!%p249_p2), %s1845_s12  ;;  %v528_v14 = vld [vmem:[%s2351_s0 + $0x10] sm:$0xff] (!%p249_p2)  ;;  %v529_v15 = vld [vmem:[%s2351_s0 + $0x18] sm:$0xff] (!%p249_p2) }
   0xe   : > { %s2063_s17 = scalar_select %p289_p3, %s2041_s9, 15  ;;  %vm2103_vm5 = vcmp.lt.s32.totalorder %v400_v23, 0  ;;  %vm374_vm6 = vcmp.lt.s32.totalorder %v373_v22, 2000  ;;  %v360_v57 = vadd.s32 %v359_v53, %v2053_v5  ;;  %v385_v59 = vstv %s1849_s13 }
   0xf   : > { %s396_s11 = scalar_select %p395_p4, 0, 255  ;;  %vm409_vm7 = vcmp.lt.s32.totalorder %v408_v52, 2000  ;;  %v386_v61 = vadd.s32 %v385_v59, %v2053_v5  ;;  %v527_v5 = vld [vmem:[%s2351_s0 + $0x8] sm:$0xff] }
  0x10   : > { %s1764_s24 = sshll.u32 %s2063_s17, 3  ;;  %vm361_vm8 = vcmp.lt.s32.totalorder %v360_v57, 2000 }
  0x11   : > { %s2083_s28 = scalar_lea.vmem %s2357_s6, %s1764_s24  ;;  %981 = vperm.xlu0 %1971, %v975_v18   ;;  %986 = vperm.xlu1 %1972, %v976_v44   ;;  %vm387_vm9 = vcmp.lt.s32.totalorder %v386_v61, 2000  ;;  %s302_s22 = scalar_lea.vmem %s2359_s8, %s1764_s24 }
  0x12   : > { %v1769_v19 = vld [vmem:[%s2083_s28 + $0x8] sm:$0xff]  ;;  %v1773_v21 = vld [vmem:[%s2083_s28 + $0x18] sm:$0xff]  ;;  %v304_v28 = vld [vmem:[%s2083_s28] sm:$0xff] }
  0x13   : > { %v1785_v20 = vld [vmem:[%s2083_s28 + $0x88] sm:$0xff]  ;;  %v323_v24 = vsel %vm322_vm0, %v1769_v19, %v2031_v0  ;;  %v349_v26 = vsel %vm348_vm1, %v1773_v21, %v2031_v0  ;;  %v1789_v27 = vld [vmem:[%s2083_s28 + $0x98] sm:$0xff]  ;;  %v1783_v29 = vld [vmem:[%s2083_s28 + $0x80] sm:$0xff]  ;;  %v311_v33 = vsel %vm310_vm2, %v304_v28, %v2031_v0 }
  0x14   : > { %v435_v25 = vsel %vm322_vm0, %v1785_v20, %v2031_v0  ;;  %v461_v32 = vsel %vm348_vm1, %v1789_v27, %v2031_v0  ;;  %v422_v34 = vsel %vm310_vm2, %v1783_v29, %v2031_v0  ;;  %v1771_v35 = vld [vmem:[%s2083_s28 + $0x10] sm:$0xff]  ;;  %v1777_v37 = vld [vmem:[%s2083_s28 + $0x28] sm:$0xff]  ;;  %v1781_v43 = vld [vmem:[%s2083_s28 + $0x38] sm:%s396_s11] }
  0x15   : > { %v1881_v31 = vpack.c.bf16 %v435_v25, %v323_v24  ;;  %v1787_v36 = vld [vmem:[%s2083_s28 + $0x90] sm:$0xff]  ;;  %v1885_v38 = vpack.c.bf16 %v461_v32, %v349_v26  ;;  %v1883_v39 = vpack.c.bf16 %v422_v34, %v311_v33  ;;  %v336_v40 = vsel %vm335_vm3, %v1771_v35, %v2031_v0  ;;  %v1793_v42 = vld [vmem:[%s2083_s28 + $0xa8] sm:$0xff]  ;;  %v1797_v48 = vld [vmem:[%s2083_s28 + $0xb8] sm:%s396_s11]  ;;  %991 = vperm.xlu0 %1971, %v977_v63  }
  0x16   : > { %v448_v41 = vsel %vm335_vm3, %v1787_v36, %v2031_v0  ;;  %v402_v46 = vsel %vm2103_vm5, %v2031_v0, %v1781_v43  ;;  %v375_v50 = vsel %vm374_vm6, %v1777_v37, %v2031_v0  ;;  %v487_v51 = vsel %vm374_vm6, %v1793_v42, %v2031_v0  ;;  %v1775_v56 = vld [vmem:[%s2083_s28 + $0x20] sm:$0xff]  ;;  %v1779_v60 = vld [vmem:[%s2083_s28 + $0x30] sm:$0xff]  ;;  %996 = vperm.xlu1 %1972, %v978_v4  }
  0x17   : > { %1882 = vmatprep.subr.bf16.mxu0 %v1881_v31  ;;  %v1887_v45 = vpack.c.bf16 %v448_v41, %v336_v40  ;;  %1886 = vmatprep.subr.bf16.mxu1 %v1885_v38  ;;  %v1889_v54 = vpack.c.bf16 %v487_v51, %v375_v50  ;;  %v514_v55 = vsel %vm2103_vm5, %v2031_v0, %v1797_v48  ;;  %v1791_v58 = vld [vmem:[%s2083_s28 + $0xa0] sm:$0xff]  ;;  %v1795_v62 = vld [vmem:[%s2083_s28 + $0xb0] sm:$0xff] }
  0x18   : > { %1884 = vmatpush1.bf16.msra.mxu0 %v1883_v39  ;;  %v410_v1 = vsel %vm409_vm7, %v402_v46, %v2031_v0  ;;  %v522_v2 = vsel %vm409_vm7, %v514_v55, %v2031_v0  ;;  %v362_v7 = vsel %vm361_vm8, %v1775_v56, %v2031_v0  ;;  %v474_v8 = vsel %vm361_vm8, %v1791_v58, %v2031_v0 }
  0x19   : > { %1888 = vmatpush1.bf16.msra.mxu1 %v1887_v45  ;;  %1890 = vmatprep.subr.bf16.mxu0 %v1889_v54  ;;  %v1893_v6 = vpack.c.bf16 %v522_v2, %v410_v1  ;;  %v1891_v9 = vpack.c.bf16 %v474_v8, %v362_v7  ;;  %v388_v10 = vsel %vm387_vm9, %v1779_v60, %v2031_v0 }
  0x1a   : > { %v500_v11 = vsel %vm387_vm9, %v1795_v62, %v2031_v0  ;;  %1404 = vperm.xlu0 %1971, %v1401_v13  }
  0x1b   : > { %1799 = vmatmul.mubr.msk.f32.vlgmr.msra.gmra.mrb[0].mxu0 %vm570_vm4, %v526_v49  ;;  %1894 = vmatprep.subr.bf16.mxu1 %v1893_v6  ;;  %v1895_v12 = vpack.c.bf16 %v500_v11, %v388_v10 }
  0x1c   : > { %1803 = vmatmul.mubr.msk.f32.vlgmr.msra.gmra.mrb[0].mxu1 %vm570_vm4, %v526_v49  ;;  %653 = vmatprep.mubr.f32.mxu0 %v1981_v3 }
  0x1d   : > { %742 = vmatprep.mubr.f32.mxu1 %v1981_v3  ;;  %1892 = vmatpush1.bf16.msra.mxu0 %v1891_v9 }
  0x1e   : > { %1896 = vmatpush1.bf16.msra.mxu1 %v1895_v12 }
  0x1f   : > { %1800 = vmatmul.mubr.msk.f32.gmra.mrb[2].mxu0 %vm570_vm4, %v527_v5 }
  0x20   : > { %1804 = vmatmul.mubr.msk.f32.gmra.mrb[2].mxu1 %vm570_vm4, %v527_v5  ;;  %659 = vmatprep.mubr.f32.mxu0 %v1981_v3 }
  0x21   : > { %748 = vmatprep.mubr.f32.mxu1 %v1981_v3 }
  0x23   : > { %1801 = vmatmul.mubr.msk.f32.gmra.mrb[4].mxu0 %vm570_vm4, %v528_v14 }
  0x24   : > { %1805 = vmatmul.mubr.msk.f32.gmra.mrb[4].mxu1 %vm570_vm4, %v528_v14  ;;  %665 = vmatprep.mubr.f32.mxu0 %v1981_v3 }
  0x25   : > { %754 = vmatprep.mubr.f32.mxu1 %v1981_v3 }
  0x27   : > { %1802 = vmatmul.mubr.msk.f32.gmra.mrb[6].mxu0 %vm570_vm4, %v529_v15 }
  0x28   : > { %1806 = vmatmul.mubr.msk.f32.gmra.mrb[6].mxu1 %vm570_vm4, %v529_v15  ;;  %825 = vmatprep.mubr.f32.mxu0 %v1981_v3 }
  0x29   : > { %914 = vmatprep.mubr.f32.mxu1 %v1981_v3 }
  0x2b   : > { %1807 = vmatmul.mubr.msk.f32.vlgmr.msra.gmra.mrb[8].mxu0 %vm570_vm4, %v526_v49 }
  0x2c   : > { %1811 = vmatmul.mubr.msk.f32.vlgmr.msra.gmra.mrb[8].mxu1 %vm570_vm4, %v526_v49  ;;  %831 = vmatprep.mubr.f32.mxu0 %v1981_v3 }
  0x2d   : > { %920 = vmatprep.mubr.f32.mxu1 %v1981_v3 }
  0x2f   : > { %1808 = vmatmul.mubr.msk.f32.gmra.mrb[10].mxu0 %vm570_vm4, %v527_v5 }
  0x30   : > { %1812 = vmatmul.mubr.msk.f32.gmra.mrb[10].mxu1 %vm570_vm4, %v527_v5  ;;  %837 = vmatprep.mubr.f32.mxu0 %v1981_v3 }
  0x31   : > { %926 = vmatprep.mubr.f32.mxu1 %v1981_v3 }
  0x33   : > { %1809 = vmatmul.mubr.msk.f32.gmra.mrb[12].mxu0 %vm570_vm4, %v528_v14 }
  0x34   : > { %1813 = vmatmul.mubr.msk.f32.gmra.mrb[12].mxu1 %vm570_vm4, %v528_v14  ;;  %843 = vmatprep.mubr.f32.mxu0 %v1981_v3 }
  0x35   : > { %932 = vmatprep.mubr.f32.mxu1 %v1981_v3 }
  0x37   : > { %1810 = vmatmul.mubr.msk.f32.gmra.mrb[14].mxu0 %vm570_vm4, %v529_v15 }
  0x38   : > { %1814 = vmatmul.mubr.msk.f32.gmra.mrb[14].mxu1 %vm570_vm4, %v529_v15  ;;  %1076 = vmatprep.mubr.f32.mxu0 %v1981_v3 }
  0x39   : > { %1165 = vmatprep.mubr.f32.mxu1 %v1981_v3 }
  0x88   : > { %v2204_v16 = vpop.permute.xlu0 %552  ;;  %v2213_v30 = vpop.permute.xlu1 %562 }
  0x8c   : > { %v2207_v22 = vpop.permute.xlu0 %557  ;;  %v2219_v52 = vpop.permute.xlu1 %567 }
  0xee   : > { %v649_v17 = vpop.f32.mrb[0].mxu0 }
  0xef   : > { %v738_v18 = vpop.f32.mrb[0].mxu1  ;;  %v651_v19 = vpop.f32.mrb[1].mxu0  ;;  %v650_v21 = vadd.f32 %v649_v17, %v2204_v16 }
  0xf0   : > { %v740_v20 = vpop.f32.mrb[1].mxu1  ;;  %v739_v23 = vadd.f32 %v738_v18, %v2204_v16  ;;  %v652_v24 = vadd.f32 %v651_v19, %v2204_v16 }
  0xf1   : > { %v741_v26 = vadd.f32 %v740_v20, %v2204_v16  ;;  %v939_v34 = vmax.f32 %v650_v21, 0.0 }
  0xf2   : > { %v655_v25 = vpop.f32.mrb[2].mxu0  ;;  %v941_v37 = vmax.f32 %v739_v23, 0.0  ;;  %v940_v38 = vmax.f32 %v652_v24, 0.0 }
  0xf3   : > { %v656_v27 = vadd.f32 %v655_v25, %v2207_v22  ;;  %v744_v28 = vpop.f32.mrb[2].mxu1  ;;  %v657_v29 = vpop.f32.mrb[3].mxu0  ;;  %v942_v42 = vmax.f32 %v741_v26, 0.0 }
  0xf4   : > { %v745_v31 = vadd.f32 %v744_v28, %v2207_v22  ;;  %v658_v32 = vadd.f32 %v657_v29, %v2207_v22  ;;  %v746_v33 = vpop.f32.mrb[3].mxu1  ;;  %v2236_v28 = vld [vmem:[%s2353_s2] sm:$0xff] }
  0xf5   : > { %v947_v35 = vmax.f32 %v656_v27, 0.0  ;;  %v747_v36 = vadd.f32 %v746_v33, %v2207_v22 }
  0xf6   : > { %v949_v39 = vmax.f32 %v745_v31, 0.0  ;;  %v948_v40 = vmax.f32 %v658_v32, 0.0  ;;  %v661_v41 = vpop.f32.mrb[4].mxu0 }
  0xf7   : > { %v1899_v43 = vpack.c.bf16 %v947_v35, %v939_v34  ;;  %v950_v44 = vmax.f32 %v747_v36, 0.0  ;;  %v750_v45 = vpop.f32.mrb[4].mxu1  ;;  %v663_v46 = vpop.f32.mrb[5].mxu0  ;;  %v662_v51 = vadd.f32 %v661_v41, %v2213_v30 }
  0xf8   : > { %v1907_v47 = vpack.c.bf16 %v949_v39, %v941_v37  ;;  %v1897_v48 = vpack.c.bf16 %v948_v40, %v940_v38  ;;  %v752_v49 = vpop.f32.mrb[5].mxu1  ;;  %v751_v53 = vadd.f32 %v750_v45, %v2213_v30  ;;  %v664_v54 = vadd.f32 %v663_v46, %v2213_v30 }
  0xf9   : > { %v1905_v50 = vpack.c.bf16 %v950_v44, %v942_v42  ;;  %v753_v56 = vadd.f32 %v752_v49, %v2213_v30  ;;  %v955_v63 = vmax.f32 %v662_v51, 0.0 }
  0xfa   : > { %v667_v55 = vpop.f32.mrb[6].mxu0  ;;  %1898 = vmatprep.subr.bf16.mxu0 %v1897_v48  ;;  %v957_v4 = vmax.f32 %v751_v53, 0.0  ;;  %v956_v5 = vmax.f32 %v664_v54, 0.0 }
  0xfb   : > { %v668_v57 = vadd.f32 %v667_v55, %v2219_v52  ;;  %v756_v58 = vpop.f32.mrb[6].mxu1  ;;  %1906 = vmatprep.subr.bf16.mxu1 %v1905_v50  ;;  %v669_v59 = vpop.f32.mrb[7].mxu0  ;;  %1900 = vmatpush1.bf16.msra.mxu0 %v1899_v43  ;;  %v958_v9 = vmax.f32 %v753_v56, 0.0 }
  0xfc   : > { %v757_v60 = vadd.f32 %v756_v58, %v2219_v52  ;;  %v670_v61 = vadd.f32 %v669_v59, %v2219_v52  ;;  %v758_v62 = vpop.f32.mrb[7].mxu1  ;;  %1908 = vmatpush1.bf16.msra.mxu1 %v1907_v47  ;;  %v973_v58 = vld [vmem:[%s2353_s2 + $0x10] sm:$0xff] }
  0xfd   : > { %v963_v1 = vmax.f32 %v668_v57, 0.0  ;;  %v759_v2 = vadd.f32 %v758_v62, %v2219_v52 }
  0xfe   : > { %v965_v6 = vmax.f32 %v757_v60, 0.0  ;;  %v964_v7 = vmax.f32 %v670_v61, 0.0  ;;  %v827_v8 = vpop.f32.mrb[8].mxu0 }
  0xff   : > { %v1903_v10 = vpack.c.bf16 %v963_v1, %v955_v63  ;;  %v966_v11 = vmax.f32 %v759_v2, 0.0  ;;  %v916_v12 = vpop.f32.mrb[8].mxu1  ;;  %v829_v13 = vpop.f32.mrb[9].mxu0  ;;  %v828_v19 = vadd.f32 %v827_v8, %v2204_v16 }
 0x100   : > { %v1911_v14 = vpack.c.bf16 %v965_v6, %v957_v4  ;;  %v1901_v15 = vpack.c.bf16 %v964_v7, %v956_v5  ;;  %v918_v17 = vpop.f32.mrb[9].mxu1  ;;  %v917_v20 = vadd.f32 %v916_v12, %v2204_v16  ;;  %v830_v21 = vadd.f32 %v829_v13, %v2204_v16 }
 0x101   : > { %v1909_v18 = vpack.c.bf16 %v966_v11, %v958_v9  ;;  %v919_v24 = vadd.f32 %v918_v17, %v2204_v16  ;;  %v943_v33 = vmax.f32 %v828_v19, 0.0  ;;  %v2297_v19 = vpop.permute.xlu1 %986 }
 0x102   : > { %v833_v23 = vpop.f32.mrb[10].mxu0  ;;  %1902 = vmatprep.subr.bf16.mxu0 %v1901_v15  ;;  %v945_v35 = vmax.f32 %v917_v20, 0.0  ;;  %v944_v36 = vmax.f32 %v830_v21, 0.0  ;;  %v2294_v15 = vpop.permute.xlu0 %981 }
 0x103   : > { %v834_v25 = vadd.f32 %v833_v23, %v2207_v22  ;;  %v922_v26 = vpop.f32.mrb[10].mxu1  ;;  %1910 = vmatprep.subr.bf16.mxu1 %v1909_v18  ;;  %v835_v27 = vpop.f32.mrb[11].mxu0  ;;  %1904 = vmatpush1.bf16.msra.mxu0 %v1903_v10  ;;  %v946_v40 = vmax.f32 %v919_v24, 0.0 }
 0x104   : > { %v923_v29 = vadd.f32 %v922_v26, %v2207_v22  ;;  %v836_v31 = vadd.f32 %v835_v27, %v2207_v22  ;;  %v924_v32 = vpop.f32.mrb[11].mxu1  ;;  %1912 = vmatpush1.bf16.msra.mxu1 %v1911_v14 }
 0x105   : > { %v951_v16 = vmax.f32 %v834_v25, 0.0  ;;  %v925_v34 = vadd.f32 %v924_v32, %v2207_v22  ;;  %v972_v22 = vld [vmem:[%s2353_s2 + $0x8] sm:$0xff] }
 0x106   : > { %v953_v37 = vmax.f32 %v923_v29, 0.0  ;;  %v952_v38 = vmax.f32 %v836_v31, 0.0  ;;  %v839_v39 = vpop.f32.mrb[12].mxu0  ;;  %1815 = vmatmul.mubr.msk.f32.vlgmr.msra.gmra.mrb[16].mxu0 %vm999_vm10, %v2236_v28 }
 0x107   : > { %v1915_v41 = vpack.c.bf16 %v951_v16, %v943_v33  ;;  %v954_v42 = vmax.f32 %v925_v34, 0.0  ;;  %v928_v43 = vpop.f32.mrb[12].mxu1  ;;  %1819 = vmatmul.mubr.msk.f32.vlgmr.msra.gmra.mrb[16].mxu1 %vm999_vm10, %v2236_v28  ;;  %v841_v44 = vpop.f32.mrb[13].mxu0  ;;  %1082 = vmatprep.mubr.f32.mxu0 %v1981_v3  ;;  %v840_v49 = vadd.f32 %v839_v39, %v2213_v30 }
 0x108   : > { %v1923_v45 = vpack.c.bf16 %v953_v37, %v945_v35  ;;  %v1913_v46 = vpack.c.bf16 %v952_v38, %v944_v36  ;;  %v930_v47 = vpop.f32.mrb[13].mxu1  ;;  %1171 = vmatprep.mubr.f32.mxu1 %v1981_v3  ;;  %v929_v50 = vadd.f32 %v928_v43, %v2213_v30  ;;  %v842_v51 = vadd.f32 %v841_v44, %v2213_v30  ;;  %v2306_v44 = vpop.permute.xlu0 %991 }
 0x109   : > { %v1921_v48 = vpack.c.bf16 %v954_v42, %v946_v40  ;;  %v931_v54 = vadd.f32 %v930_v47, %v2213_v30  ;;  %v959_v62 = vmax.f32 %v840_v49, 0.0  ;;  %v2309_v49 = vpop.permute.xlu1 %996 }
 0x10a   : > { %v845_v53 = vpop.f32.mrb[14].mxu0  ;;  %1816 = vmatmul.mubr.msk.f32.gmra.mrb[18].mxu0 %vm999_vm10, %v972_v22  ;;  %1914 = vmatprep.subr.bf16.mxu0 %v1913_v46  ;;  %v961_v1 = vmax.f32 %v929_v50, 0.0  ;;  %v960_v2 = vmax.f32 %v842_v51, 0.0 }
 0x10b   : > { %v846_v55 = vadd.f32 %v845_v53, %v2219_v52  ;;  %v934_v56 = vpop.f32.mrb[14].mxu1  ;;  %1820 = vmatmul.mubr.msk.f32.gmra.mrb[18].mxu1 %vm999_vm10, %v972_v22  ;;  %1922 = vmatprep.subr.bf16.mxu1 %v1921_v48  ;;  %v847_v57 = vpop.f32.mrb[15].mxu0  ;;  %v962_v6 = vmax.f32 %v931_v54, 0.0 }
 0x10c   : > { %v935_v59 = vadd.f32 %v934_v56, %v2219_v52  ;;  %v848_v60 = vadd.f32 %v847_v57, %v2219_v52  ;;  %v936_v61 = vpop.f32.mrb[15].mxu1  ;;  %1916 = vmatpush1.bf16.msra.mxu0 %v1915_v41  ;;  %1924 = vmatpush1.bf16.msra.mxu1 %v1923_v45 }
 0x10d   : > { %v967_v30 = vmax.f32 %v846_v55, 0.0  ;;  %v937_v63 = vadd.f32 %v936_v61, %v2219_v52  ;;  %1088 = vmatprep.mubr.f32.mxu0 %v1981_v3  ;;  %1177 = vmatprep.mubr.f32.mxu1 %v1981_v3  ;;  %v974_v52 = vld [vmem:[%s2353_s2 + $0x18] sm:$0xff] }
 0x10e   : > { %v969_v4 = vmax.f32 %v935_v59, 0.0  ;;  %v968_v5 = vmax.f32 %v848_v60, 0.0  ;;  %1817 = vmatmul.mubr.msk.f32.gmra.mrb[20].mxu0 %vm999_vm10, %v973_v58 }
 0x10f   : > { %v1919_v7 = vpack.c.bf16 %v967_v30, %v959_v62  ;;  %v970_v8 = vmax.f32 %v937_v63, 0.0  ;;  %1821 = vmatmul.mubr.msk.f32.gmra.mrb[20].mxu1 %vm999_vm10, %v973_v58  ;;  %1094 = vmatprep.mubr.f32.mxu0 %v1981_v3 }
 0x110   : > { %v1927_v9 = vpack.c.bf16 %v969_v4, %v961_v1  ;;  %v1917_v10 = vpack.c.bf16 %v968_v5, %v960_v2  ;;  %1183 = vmatprep.mubr.f32.mxu1 %v1981_v3 }
 0x111   : > { %v1925_v11 = vpack.c.bf16 %v970_v8, %v962_v6 }
 0x112   : > { %1818 = vmatmul.mubr.msk.f32.gmra.mrb[22].mxu0 %vm999_vm10, %v974_v52  ;;  %1918 = vmatprep.subr.bf16.mxu0 %v1917_v10 }
 0x113   : > { %1822 = vmatmul.mubr.msk.f32.gmra.mrb[22].mxu1 %vm999_vm10, %v974_v52  ;;  %1926 = vmatprep.subr.bf16.mxu1 %v1925_v11 }
 0x114   : > { %1920 = vmatpush1.bf16.msra.mxu0 %v1919_v7  ;;  %1928 = vmatpush1.bf16.msra.mxu1 %v1927_v9 }
 0x115   : > { %1254 = vmatprep.mubr.f32.mxu0 %v1981_v3  ;;  %1343 = vmatprep.mubr.f32.mxu1 %v1981_v3 }
 0x117   : > { %1823 = vmatmul.mubr.msk.f32.vlgmr.msra.gmra.mrb[24].mxu0 %vm999_vm10, %v2236_v28  ;;  %1827 = vmatmul.mubr.msk.f32.vlgmr.msra.gmra.mrb[24].mxu1 %vm999_vm10, %v2236_v28 }
 0x118   : > { %1260 = vmatprep.mubr.f32.mxu0 %v1981_v3  ;;  %1349 = vmatprep.mubr.f32.mxu1 %v1981_v3 }
 0x11b   : > { %1824 = vmatmul.mubr.msk.f32.gmra.mrb[26].mxu0 %vm999_vm10, %v972_v22  ;;  %1828 = vmatmul.mubr.msk.f32.gmra.mrb[26].mxu1 %vm999_vm10, %v972_v22 }
 0x11c   : > { %1266 = vmatprep.mubr.f32.mxu0 %v1981_v3  ;;  %1355 = vmatprep.mubr.f32.mxu1 %v1981_v3 }
 0x11f   : > { %1825 = vmatmul.mubr.msk.f32.gmra.mrb[28].mxu0 %vm999_vm10, %v973_v58  ;;  %1829 = vmatmul.mubr.msk.f32.gmra.mrb[28].mxu1 %vm999_vm10, %v973_v58 }
 0x120   : > { %1272 = vmatprep.mubr.f32.mxu0 %v1981_v3  ;;  %1361 = vmatprep.mubr.f32.mxu1 %v1981_v3 }
 0x123   : > { %1826 = vmatmul.mubr.msk.f32.gmra.mrb[30].mxu0 %vm999_vm10, %v974_v52  ;;  %1830 = vmatmul.mubr.msk.f32.gmra.mrb[30].mxu1 %vm999_vm10, %v974_v52 }
 0x124   : > { %1474 = vmatprep.mubr.f32.mxu0 %v1981_v3  ;;  %1545 = vmatprep.mubr.f32.mxu1 %v1981_v3 }
 0x1d9   : > { %v1078_v12 = vpop.f32.mrb[16].mxu0 }
 0x1da   : > { %v1167_v13 = vpop.f32.mrb[16].mxu1  ;;  %v1080_v14 = vpop.f32.mrb[17].mxu0  ;;  %v1079_v18 = vadd.f32 %v1078_v12, %v2294_v15 }
 0x1db   : > { %v1169_v17 = vpop.f32.mrb[17].mxu1  ;;  %v1168_v20 = vadd.f32 %v1167_v13, %v2294_v15  ;;  %v1081_v21 = vadd.f32 %v1080_v14, %v2294_v15 }
 0x1dc   : > { %v1170_v24 = vadd.f32 %v1169_v17, %v2294_v15  ;;  %v1368_v32 = vmax.f32 %v1079_v18, 0.0 }
 0x1dd   : > { %v1084_v23 = vpop.f32.mrb[18].mxu0  ;;  %v1370_v34 = vmax.f32 %v1168_v20, 0.0  ;;  %v1369_v35 = vmax.f32 %v1081_v21, 0.0 }
 0x1de   : > { %v1085_v25 = vadd.f32 %v1084_v23, %v2297_v19  ;;  %v1173_v26 = vpop.f32.mrb[18].mxu1  ;;  %v1086_v27 = vpop.f32.mrb[19].mxu0  ;;  %v1371_v39 = vmax.f32 %v1170_v24, 0.0  ;;  %v1400_v24 = vld [vmem:[%s2355_s4] sm:$0xff] }
 0x1df   : > { %v1174_v28 = vadd.f32 %v1173_v26, %v2297_v19  ;;  %v1087_v29 = vadd.f32 %v1086_v27, %v2297_v19  ;;  %v1175_v31 = vpop.f32.mrb[19].mxu1 }
 0x1e0   : > { %v1376_v33 = vmax.f32 %v1085_v25, 0.0  ;;  %v1176_v16 = vadd.f32 %v1175_v31, %v2297_v19 }
 0x1e1   : > { %v1378_v36 = vmax.f32 %v1174_v28, 0.0  ;;  %v1377_v37 = vmax.f32 %v1087_v29, 0.0  ;;  %v1090_v38 = vpop.f32.mrb[20].mxu0 }
 0x1e2   : > { %v1931_v40 = vpack.c.bf16 %v1376_v33, %v1368_v32  ;;  %v1379_v41 = vmax.f32 %v1176_v16, 0.0  ;;  %v1179_v42 = vpop.f32.mrb[20].mxu1  ;;  %v1092_v43 = vpop.f32.mrb[21].mxu0  ;;  %v1091_v48 = vadd.f32 %v1090_v38, %v2306_v44 }
 0x1e3   : > { %v1939_v22 = vpack.c.bf16 %v1378_v36, %v1370_v34  ;;  %v1929_v45 = vpack.c.bf16 %v1377_v37, %v1369_v35  ;;  %v1181_v46 = vpop.f32.mrb[21].mxu1  ;;  %v1180_v50 = vadd.f32 %v1179_v42, %v2306_v44  ;;  %v1093_v51 = vadd.f32 %v1092_v43, %v2306_v44 }
 0x1e4   : > { %v1937_v47 = vpack.c.bf16 %v1379_v41, %v1371_v39  ;;  %v1182_v54 = vadd.f32 %v1181_v46, %v2306_v44  ;;  %v1384_v61 = vmax.f32 %v1091_v48, 0.0 }
 0x1e5   : > { %v1096_v53 = vpop.f32.mrb[22].mxu0  ;;  %1930 = vmatprep.subr.bf16.mxu0 %v1929_v45  ;;  %v1386_v63 = vmax.f32 %v1180_v50, 0.0  ;;  %v1385_v1 = vmax.f32 %v1093_v51, 0.0 }
 0x1e6   : > { %v1097_v55 = vadd.f32 %v1096_v53, %v2309_v49  ;;  %v1185_v56 = vpop.f32.mrb[22].mxu1  ;;  %1938 = vmatprep.subr.bf16.mxu1 %v1937_v47  ;;  %v1098_v57 = vpop.f32.mrb[23].mxu0  ;;  %1932 = vmatpush1.bf16.msra.mxu0 %v1931_v40  ;;  %v1387_v5 = vmax.f32 %v1182_v54, 0.0 }
 0x1e7   : > { %v1186_v58 = vadd.f32 %v1185_v56, %v2309_v49  ;;  %v1099_v59 = vadd.f32 %v1098_v57, %v2309_v49  ;;  %v1187_v60 = vpop.f32.mrb[23].mxu1  ;;  %1940 = vmatpush1.bf16.msra.mxu1 %v1939_v22 }
 0x1e8   : > { %v1392_v62 = vmax.f32 %v1097_v55, 0.0  ;;  %v1188_v30 = vadd.f32 %v1187_v60, %v2309_v49 }
 0x1e9   : > { %v1394_v2 = vmax.f32 %v1186_v58, 0.0  ;;  %v1393_v4 = vmax.f32 %v1099_v59, 0.0 }
 0x1ea   : > { %v1935_v6 = vpack.c.bf16 %v1392_v62, %v1384_v61  ;;  %v1395_v7 = vmax.f32 %v1188_v30, 0.0  ;;  %v1256_v8 = vpop.f32.mrb[24].mxu0  ;;  %v1345_v52 = vpop.f32.mrb[24].mxu1 }
 0x1eb   : > { %v1943_v9 = vpack.c.bf16 %v1394_v2, %v1386_v63  ;;  %v1933_v10 = vpack.c.bf16 %v1393_v4, %v1385_v1  ;;  %v1258_v11 = vpop.f32.mrb[25].mxu0  ;;  %v1347_v12 = vpop.f32.mrb[25].mxu1  ;;  %v1257_v14 = vadd.f32 %v1256_v8, %v2294_v15  ;;  %v1346_v17 = vadd.f32 %v1345_v52, %v2294_v15 }
 0x1ec   : > { %v1941_v13 = vpack.c.bf16 %v1395_v7, %v1387_v5  ;;  %v1259_v18 = vadd.f32 %v1258_v11, %v2294_v15  ;;  %v1348_v20 = vadd.f32 %v1347_v12, %v2294_v15 }
 0x1ed   : > { %1934 = vmatprep.subr.bf16.mxu0 %v1933_v10  ;;  %v1372_v15 = vmax.f32 %v1257_v14, 0.0  ;;  %v1374_v32 = vmax.f32 %v1346_v17, 0.0 }
 0x1ee   : > { %v1262_v21 = vpop.f32.mrb[26].mxu0  ;;  %v1351_v23 = vpop.f32.mrb[26].mxu1  ;;  %1942 = vmatprep.subr.bf16.mxu1 %v1941_v13  ;;  %1936 = vmatpush1.bf16.msra.mxu0 %v1935_v6  ;;  %v1373_v34 = vmax.f32 %v1259_v18, 0.0  ;;  %v1375_v35 = vmax.f32 %v1348_v20, 0.0 }
 0x1ef   : > { %v1263_v25 = vadd.f32 %v1262_v21, %v2297_v19  ;;  %v1352_v26 = vadd.f32 %v1351_v23, %v2297_v19  ;;  %v1264_v27 = vpop.f32.mrb[27].mxu0  ;;  %v1353_v28 = vpop.f32.mrb[27].mxu1  ;;  %1944 = vmatpush1.bf16.msra.mxu1 %v1943_v9 }
 0x1f0   : > { %v1265_v29 = vadd.f32 %v1264_v27, %v2297_v19  ;;  %v1354_v31 = vadd.f32 %v1353_v28, %v2297_v19 }
 0x1f1   : > { %v1380_v33 = vmax.f32 %v1263_v25, 0.0  ;;  %v1382_v16 = vmax.f32 %v1352_v26, 0.0  ;;  %1831 = vmatmul.mubr.msk.f32.vlgmr.msra.gmra.mrb[32].mxu0 %vm999_vm10, %v1400_v24 }
 0x1f2   : > { %v1381_v36 = vmax.f32 %v1265_v29, 0.0  ;;  %v1383_v37 = vmax.f32 %v1354_v31, 0.0  ;;  %v1268_v38 = vpop.f32.mrb[28].mxu0  ;;  %v1357_v39 = vpop.f32.mrb[28].mxu1  ;;  %1832 = vmatmul.mubr.msk.f32.vlgmr.msra.gmra.mrb[32].mxu1 %vm999_vm10, %v1400_v24  ;;  %1616 = vmatprep.mubr.f32.mxu0 %v1981_v3 }
 0x1f3   : > { %v1947_v40 = vpack.c.bf16 %v1380_v33, %v1372_v15  ;;  %v1955_v41 = vpack.c.bf16 %v1382_v16, %v1374_v32  ;;  %v1270_v42 = vpop.f32.mrb[29].mxu0  ;;  %v1359_v19 = vpop.f32.mrb[29].mxu1  ;;  %1687 = vmatprep.mubr.f32.mxu1 %v1981_v3  ;;  %v1269_v45 = vadd.f32 %v1268_v38, %v2306_v44  ;;  %v1358_v46 = vadd.f32 %v1357_v39, %v2306_v44 }
 0x1f4   : > { %v1945_v43 = vpack.c.bf16 %v1381_v36, %v1373_v34  ;;  %v1953_v22 = vpack.c.bf16 %v1383_v37, %v1375_v35  ;;  %v1271_v47 = vadd.f32 %v1270_v42, %v2306_v44  ;;  %v1360_v48 = vadd.f32 %v1359_v19, %v2306_v44 }
 0x1f5   : > { %v1388_v58 = vmax.f32 %v1269_v45, 0.0  ;;  %v1390_v59 = vmax.f32 %v1358_v46, 0.0 }
 0x1f6   : > { %v1274_v50 = vpop.f32.mrb[30].mxu0  ;;  %v1363_v51 = vpop.f32.mrb[30].mxu1  ;;  %1946 = vmatprep.subr.bf16.mxu0 %v1945_v43  ;;  %1954 = vmatprep.subr.bf16.mxu1 %v1953_v22  ;;  %v1389_v61 = vmax.f32 %v1271_v47, 0.0  ;;  %v1391_v62 = vmax.f32 %v1360_v48, 0.0 }
 0x1f7   : > { %v1275_v53 = vadd.f32 %v1274_v50, %v2309_v49  ;;  %v1364_v54 = vadd.f32 %v1363_v51, %v2309_v49  ;;  %v1276_v55 = vpop.f32.mrb[31].mxu0  ;;  %v1365_v3 = vpop.f32.mrb[31].mxu1  ;;  %1948 = vmatpush1.bf16.msra.mxu0 %v1947_v40  ;;  %1956 = vmatpush1.bf16.msra.mxu1 %v1955_v41 }
 0x1f8   : > { %v1277_v56 = vadd.f32 %v1276_v55, %v2309_v49  ;;  %v1366_v57 = vadd.f32 %v1365_v3, %v2309_v49  ;;  %v1405_v49 = vpop.permute.xlu0 %1404 }
 0x1f9   : > { %v1396_v60 = vmax.f32 %v1275_v53, 0.0  ;;  %v1398_v44 = vmax.f32 %v1364_v54, 0.0 }
 0x1fa   : > { %v1397_v30 = vmax.f32 %v1277_v56, 0.0  ;;  %v1399_v63 = vmax.f32 %v1366_v57, 0.0 }
 0x1fb   : > { %v1951_v1 = vpack.c.bf16 %v1396_v60, %v1388_v58  ;;  %v1959_v2 = vpack.c.bf16 %v1398_v44, %v1390_v59 }
 0x1fc   : > { %v1949_v4 = vpack.c.bf16 %v1397_v30, %v1389_v61  ;;  %v1957_v5 = vpack.c.bf16 %v1399_v63, %v1391_v62 }
 0x1fe   : > { %1950 = vmatprep.subr.bf16.mxu0 %v1949_v4  ;;  %1958 = vmatprep.subr.bf16.mxu1 %v1957_v5 }
 0x1ff   : > { %1952 = vmatpush1.bf16.msra.mxu0 %v1951_v1  ;;  %1960 = vmatpush1.bf16.msra.mxu1 %v1959_v2 }
 0x202   : > { %1833 = vmatmul.mubr.msk.f32.vlgmr.msra.gmra.mrb[34].mxu0 %vm999_vm10, %v1400_v24  ;;  %1834 = vmatmul.mubr.msk.f32.vlgmr.msra.gmra.mrb[34].mxu1 %vm999_vm10, %v1400_v24 }
 0x2c4   : > { %v1476_v6 = vpop.f32.mrb[32].mxu0 }
 0x2c5   : > { %v1477_v7 = vadd.f32 %v1476_v6, %v1405_v49  ;;  %v1547_v8 = vpop.f32.mrb[32].mxu1  ;;  %v1478_v52 = vpop.f32.mrb[33].mxu0 }
 0x2c6   : > { %v1548_v9 = vadd.f32 %v1547_v8, %v1405_v49  ;;  %v1479_v10 = vadd.f32 %v1478_v52, %v1405_v49  ;;  %v1549_v11 = vpop.f32.mrb[33].mxu1 }
 0x2c7   : > { %1694 = vst [vmem:[%s302_s22] sm:$0xff] %v1477_v7  ;;  %v1550_v12 = vadd.f32 %v1549_v11, %v1405_v49 }
 0x2c8   : > { %1696 = vst [vmem:[%s302_s22 + $0x10] sm:$0xff] %v1548_v9  ;;  %1695 = vst [vmem:[%s302_s22 + $0x8] sm:$0xff] %v1479_v10 }
 0x2c9   : > { %1697 = vst [vmem:[%s302_s22 + $0x18] sm:$0xff] %v1550_v12 }
 0x2d5   : > { %v1618_v13 = vpop.f32.mrb[34].mxu0  ;;  %v1689_v14 = vpop.f32.mrb[34].mxu1 }
 0x2d6   : > { %v1619_v17 = vadd.f32 %v1618_v13, %v1405_v49  ;;  %v1690_v18 = vadd.f32 %v1689_v14, %v1405_v49  ;;  %v1620_v20 = vpop.f32.mrb[35].mxu0  ;;  %v1691_v21 = vpop.f32.mrb[35].mxu1 }
 0x2d7   : > { %v1621_v23 = vadd.f32 %v1620_v20, %v1405_v49  ;;  %v1692_v24 = vadd.f32 %v1691_v21, %v1405_v49 }
 0x2d8   : > { %1698 = vst [vmem:[%s302_s22 + $0x20] sm:$0xff] %v1619_v17  ;;  %1700 = vst [vmem:[%s302_s22 + $0x30] sm:$0xff] %v1690_v18 }
 0x2d9   : > { %1699 = vst [vmem:[%s302_s22 + $0x28] sm:$0xff] %v1621_v23  ;;  %1701 = vst [vmem:[%s302_s22 + $0x38] sm:$0xff] %v1692_v24 }
 0x2da PF: > { %s19_s29 = sadd.s32 1, %s1979_s29  }
 0x2db   : > { %p16_p5 = scmp.ge.s32.totalorder %s19_s29, 4  }
 0x2dd   :  { %18 = sbr.rel (!%p16_p5) target bundleno = 2 (0x2), region = 108 }

</bundles_post_ra>
